<compile_context>
chip_gen: v7x
topology: tpu7x:2x2x1
jax: 0.10.0
libtpu: 0.0.40
codegen_flags: <defaults>
</compile_context>

<pallas_src>
import functools

import jax
import jax.numpy as jnp
from jax.experimental import pallas as pl
from jax.experimental.pallas import tpu as pltpu


def _round_up(x, m):
    return ((x + m - 1) // m) * m


def _patch_embed_kernel(x_ref, w_ref, b_ref, o_ref):
    # x_ref: (TM, K), w_ref: (K, TE), b_ref: (1, TE) f32, o_ref: (TM, TE)
    acc = jnp.dot(x_ref[...], w_ref[...], preferred_element_type=jnp.float32)
    o_ref[...] = (acc + b_ref[...]).astype(o_ref.dtype)


def _choose_tiles(M, K, E, in_itemsize, out_itemsize,
                  vmem_budget=24 * 1024 * 1024):
    """Pick (TM, TE): (8,128)-aligned, as large as the VMEM budget allows,
    assuming double-buffering on every operand."""
    e128 = _round_up(E, 128)
    TE = e128 if e128 <= 2048 else 512           # single E tile for PixArt (E=1152)
    TM = min(1024, _round_up(M, 8))

    def vmem_bytes(tm, te):
        return (2 * tm * K * in_itemsize          # patches tile (x2 buffers)
                + 2 * K * te * in_itemsize        # weight tile
                + 2 * te * 4                      # bias tile (f32)
                + 2 * tm * te * out_itemsize)     # output tile

    while TM > 8 and vmem_bytes(TM, TE) > vmem_budget:
        TM = max(8, _round_up(TM // 2, 8))
    while TE > 128 and vmem_bytes(TM, TE) > vmem_budget:
        TE = max(128, _round_up(TE // 2, 128))
    return TM, TE


@functools.partial(jax.jit,
                   static_argnames=("patch_size", "flatten", "compute_dtype"))
def patch_embed(x, weight, bias, patch_size, flatten=True, compute_dtype=None):
    """x: (B, C, H, W) NCHW; weight: (E, C, p, p); bias: (E,)."""
    B, C, H, W = x.shape
    E = weight.shape[0]
    p = patch_size
    assert H % p == 0 and W % p == 0, "image dims must be divisible by patch_size"
    Hp, Wp = H // p, W // p
    N = Hp * Wp
    K = C * p * p
    M = B * N
    out_dtype = jnp.dtype(x.dtype)
    cdt = jnp.dtype(compute_dtype) if compute_dtype is not None else out_dtype

    # --- Glue: patchify + weight reshape (conv reduction order (C, kh, kw)).
    # TODO(synk): for huge pixel-space inputs, move the patchify into the kernel
    # (grid over (B, Hp)) to avoid an extra HBM round-trip; for PixArt latents
    # (tiny C*p*p) the wrapper-side rearrange is negligible and fuses with pads.
    patches = x.reshape(B, C, Hp, p, Wp, p).transpose(0, 2, 4, 1, 3, 5)
    patches = patches.reshape(M, K).astype(cdt)            # (M, K)
    w_mat = weight.reshape(E, K).T.astype(cdt)              # (K, E)
    b_mat = bias.reshape(1, E).astype(jnp.float32)          # bias added in f32

    # --- Tiling / padding (lane-dense, (8,128)-aligned).
    TM, TE = _choose_tiles(M, K, E, cdt.itemsize, out_dtype.itemsize)
    M_pad = _round_up(M, TM)
    E_pad = _round_up(E, TE)
    if M_pad != M:
        patches = jnp.pad(patches, ((0, M_pad - M), (0, 0)))
    if E_pad != E:
        w_mat = jnp.pad(w_mat, ((0, 0), (0, E_pad - E)))
        b_mat = jnp.pad(b_mat, ((0, 0), (0, E_pad - E)))

    n_e, n_m = E_pad // TE, M_pad // TM

    cost = pl.CostEstimate(
        flops=2 * M * K * E,
        transcendentals=0,
        bytes_accessed=(cdt.itemsize * (M * K + K * E)
                        + out_dtype.itemsize * M * E + 4 * E),
    )

    out = pl.pallas_call(
        _patch_embed_kernel,
        out_shape=jax.ShapeDtypeStruct((M_pad, E_pad), out_dtype),
        # E-tiles outer, M-tiles inner: weight/bias block index is constant
        # across consecutive steps, so Pallas keeps them resident in VMEM.
        grid=(n_e, n_m),
        in_specs=[
            pl.BlockSpec((TM, K), lambda j, i: (i, 0)),
            pl.BlockSpec((K, TE), lambda j, i: (0, j)),
            pl.BlockSpec((1, TE), lambda j, i: (0, j)),
        ],
        out_specs=pl.BlockSpec((TM, TE), lambda j, i: (i, j)),
        compiler_params=pltpu.CompilerParams(
            # K un-tiled -> no reduction axis; both axes are independent
            # (v7x can shard the grid across both TensorCores).
            dimension_semantics=("parallel", "parallel"),
            vmem_limit_bytes=32 * 1024 * 1024,
        ),
        cost_estimate=cost,
    )(patches, w_mat, b_mat)

    out = out[:M, :E].reshape(B, N, E)
    if not flatten:
        out = out.reshape(B, Hp, Wp, E).transpose(0, 3, 1, 2)  # NCHW conv output
    # norm_layer=None -> Identity
    return out


def _reference(x, weight, bias, patch_size):
    B, C, H, W = x.shape
    E = weight.shape[0]
    p = patch_size
    Hp, Wp = H // p, W // p
    patches = x.reshape(B, C, Hp, p, Wp, p).transpose(0, 2, 4, 1, 3, 5)
    patches = patches.reshape(B, Hp * Wp, C * p * p)
    w_mat = weight.reshape(E, -1).T
    return patches @ w_mat + bias[None, None, :]


if __name__ == "__main__":
    # Small shapes: B=2, in_chans=4, H=W=16, patch_size=4, embed_dim=32
    B, C, H, W = 2, 4, 16, 16
    patch_size = 4
    embed_dim = 32

    key = jax.random.PRNGKey(0)
    kx, kw, kb = jax.random.split(key, 3)
    x = jax.random.normal(kx, (B, C, H, W), dtype=jnp.float32)
    weight = jax.random.normal(kw, (embed_dim, C, patch_size, patch_size),
                               dtype=jnp.float32) * 0.05
    bias = jax.random.normal(kb, (embed_dim,), dtype=jnp.float32) * 0.05

    ref = _reference(x, weight, bias, patch_size)
    N = (H // patch_size) * (W // patch_size)

    # f32 path (strict check).
    out = jax.block_until_ready(patch_embed(x, weight, bias, patch_size))
    assert out.shape == (B, N, embed_dim)
    assert jnp.allclose(out, ref, atol=1e-4, rtol=1e-4)

    # bf16-input / f32-accumulate path (bandwidth-saving option; loose check).
    out_bf16 = jax.block_until_ready(
        patch_embed(x, weight, bias, patch_size, compute_dtype=jnp.bfloat16))
    assert out_bf16.shape == (B, N, embed_dim)
    assert jnp.allclose(out_bf16, ref, atol=2e-2, rtol=2e-2)

    # flatten=False returns the NCHW conv output.
    out_nchw = jax.block_until_ready(
        patch_embed(x, weight, bias, patch_size, flatten=False))
    assert out_nchw.shape == (B, embed_dim, H // patch_size, W // patch_size)

    print("KERNEL_OK")
</pallas_src>

<mosaic_0001>
module attributes {stable_mosaic.version = 11 : i64} {
  func.func @_patch_embed_kernel(%arg0: i32, %arg1: i32, %arg2: memref<32x64xf32, #tpu.memory_space<vmem>>, %arg3: memref<64x128xf32, #tpu.memory_space<vmem>>, %arg4: memref<1x128xf32, #tpu.memory_space<vmem>>, %arg5: memref<32x128xf32, #tpu.memory_space<vmem>>) attributes {dimension_semantics = [#tpu.dimension_semantics<parallel>, #tpu.dimension_semantics<parallel>], iteration_bounds = array<i64: 1, 1>, scalar_prefetch = 0 : i64, scratch_operands = 0 : i64, tpu.core_type = #tpu.core_type<tc>, window_params = [{transform_indices = @transform_0, window_bounds = array<i64: 32, 64>}, {transform_indices = @transform_1, window_bounds = array<i64: 64, 128>}, {transform_indices = @transform_2, window_bounds = array<i64: 1, 128>}, {transform_indices = @transform_3, window_bounds = array<i64: 32, 128>}]} {
    %c0 = arith.constant 0 : index
    %c0_0 = arith.constant 0 : index
    %0 = vector.load %arg2[%c0, %c0_0] : memref<32x64xf32, #tpu.memory_space<vmem>>, vector<32x64xf32>
    %c0_1 = arith.constant 0 : index
    %c0_2 = arith.constant 0 : index
    %1 = vector.load %arg3[%c0_1, %c0_2] : memref<64x128xf32, #tpu.memory_space<vmem>>, vector<64x128xf32>
    %cst = arith.constant dense<0.000000e+00> : vector<32x128xf32>
    %2 = tpu.matmul %0, %1, %cst {dimension_numbers = #tpu.dot_dimension_numbers<[1], [0], [0], [1], [0, 0, 1, 1], [], []>} : vector<32x64xf32>, vector<64x128xf32>, vector<32x128xf32> -> vector<32x128xf32>
    %c0_3 = arith.constant 0 : index
    %c0_4 = arith.constant 0 : index
    %3 = vector.load %arg4[%c0_3, %c0_4] : memref<1x128xf32, #tpu.memory_space<vmem>>, vector<1x128xf32>
    %4 = vector.broadcast %3 : vector<1x128xf32> to vector<32x128xf32>
    %5 = arith.addf %2, %4 : vector<32x128xf32>
    %c0_5 = arith.constant 0 : index
    %c0_6 = arith.constant 0 : index
    %6 = vector.load %arg5[%c0_5, %c0_6] : memref<32x128xf32, #tpu.memory_space<vmem>>, vector<32x128xf32>
    tpu.vector_store %arg5[%c0_5, %c0_6], %5 {strides = array<i32>} : memref<32x128xf32, #tpu.memory_space<vmem>>, vector<32x128xf32>,
    return
  }
  func.func @transform_0(%arg0: i32, %arg1: i32) -> (i32, i32) {
    %c0_i32 = arith.constant 0 : i32
    %c0_i32_0 = arith.constant 0 : i32
    return %arg1, %c0_i32 : i32, i32
  }
  func.func @transform_1(%arg0: i32, %arg1: i32) -> (i32, i32) {
    %c0_i32 = arith.constant 0 : i32
    %c0_i32_0 = arith.constant 0 : i32
    return %c0_i32, %arg0 : i32, i32
  }
  func.func @transform_2(%arg0: i32, %arg1: i32) -> (i32, i32) {
    %c0_i32 = arith.constant 0 : i32
    %c0_i32_0 = arith.constant 0 : i32
    return %c0_i32, %arg0 : i32, i32
  }
  func.func @transform_3(%arg0: i32, %arg1: i32) -> (i32, i32) {
    %c0_i32 = arith.constant 0 : i32
    return %arg1, %arg0 : i32, i32
  }
}

</mosaic_0001>

<bundles_post_ra>
// kernel: patch_embed.1
= control target key start
LH: loop header
LB: loop body
LE: loop exit
PB: predicated region body
PF: predicated region fallthrough
CT: control target
= control target key end

     0   :  { %vm34_vm0 = vcmask 523264   ;;  %s320_s0 = inlined_call_operand.vmem [shape: f32[32,64], index: 0, kind: input, shape index: {}]   ;;  %s321_s1 = inlined_call_operand.vmem [shape: f32[64,128], index: 1, kind: input, shape index: {}]   ;;  %s322_s2 = inlined_call_operand.vmem [shape: f32[1,128], index: 2, kind: input, shape index: {}]   ;;  %s323_s3 = inlined_call_operand.hbm [shape: f32[32,128], index: 3, kind: output, shape index: {}]  }
   0x1   :  { %v19_v0 = vld [vmem:[%s321_s1] sm:$0xff]  ;;  %v20_v1 = vld [vmem:[%s321_s1 + $0x8] sm:$0xff]  ;;  %v21_v2 = vld [vmem:[%s321_s1 + $0x10] sm:$0xff] }
   0x2   :  { %v191_v3 = vpack.c.bf16 %v20_v1, %v19_v0  ;;  %v22_v4 = vld [vmem:[%s321_s1 + $0x18] sm:$0xff]  ;;  %v23_v6 = vld [vmem:[%s321_s1 + $0x20] sm:$0xff]  ;;  %v24_v7 = vld [vmem:[%s321_s1 + $0x28] sm:$0xff] }
   0x3   :  { %v195_v5 = vpack.c.bf16 %v22_v4, %v21_v2  ;;  %v15_v8 = vld [vmem:[%s320_s0] sm:$0xff]  ;;  %v17_v9 = vld [vmem:[%s320_s0 + $0x10] sm:$0xff] }
   0x4   :  { %192 = vmatprep.subr.bf16.mxu0 %v191_v3  ;;  %207 = vmatprep.subr.bf16.mxu1 %v191_v3 }
   0x5   :  { %194 = vmatpush3.bf16.msra.mxu0 %v191_v3  ;;  %211 = vmatpush3.bf16.msra.mxu1 %v191_v3 }
   0x6   :  { %8 = vsyncpa [#allocation3], 0  ;;  %196 = vmatprep.subr.bf16.mxu0 %v195_v5  ;;  %208 = vmatprep.subr.bf16.mxu1 %v195_v5  ;;  %v199_v10 = vpack.c.bf16 %v24_v7, %v23_v6  ;;  %v25_v11 = vld [vmem:[%s321_s1 + $0x30] sm:$0xff]  ;;  %v26_v12 = vld [vmem:[%s321_s1 + $0x38] sm:$0xff]  ;;  %s242_s10 = smov [#allocation2]  }
   0x7   :  { %185 = vmatprep.mubr.msk.f32.mxu0 %vm34_vm0, %v15_v8  ;;  %188 = vmatprep.mubr.msk.f32.mxu1 %vm34_vm0, %v17_v9  ;;  %v203_v13 = vpack.c.bf16 %v26_v12, %v25_v11  ;;  %v16_v14 = vld [vmem:[%s320_s0 + $0x8] sm:$0xff]  ;;  %v18_v15 = vld [vmem:[%s320_s0 + $0x18] sm:$0xff]  ;;  %v152_v16 = vld [vmem:[%s322_s2] ss:$0 sm:$0xff]  ;;  %s141_s11 = sshll.u32 %s242_s10, 4  ;;  %s142_s11 = int_to_ptr.vmem [resolvable:$true] %s141_s11 }
   0x8   :  { %s218_s0 = scalar_lea.vmem %s142_s11, 512  ;;  %p223_p1 = scmp.lt.s32.totalorder %s142_s11, %s142_s11 }
   0x9   :  { %198 = vmatpush3.bf16.msra.mxu0 %v195_v5  ;;  %212 = vmatpush3.bf16.msra.mxu1 %v195_v5  ;;  %p219_p0 = scmp.ne.s32.totalorder %s142_s11, %s218_s0  ;;  %p224_p2 = scmp.lt.s32.totalorder %s218_s0, %s218_s0 }
   0xa   :  { %200 = vmatprep.subr.bf16.mxu0 %v199_v10  ;;  %209 = vmatprep.subr.bf16.mxu1 %v199_v10 }
   0xb   :  { %p225_p3 = por %p224_p2, %p223_p1 }
   0xd   :  { %202 = vmatpush3.bf16.msra.mxu0 %v199_v10  ;;  %213 = vmatpush3.bf16.msra.mxu1 %v199_v10  ;;  %p226_p4 = pnand %p225_p3, %p219_p0 }
   0xe   :  { %204 = vmatprep.subr.bf16.mxu0 %v203_v13  ;;  %210 = vmatprep.subr.bf16.mxu1 %v203_v13 }
  0x11   :  { %206 = vmatpush3.bf16.msra.mxu0 %v203_v13  ;;  %214 = vmatpush3.bf16.msra.mxu1 %v203_v13 }
  0x14   :  { %186 = vmatmul.mubr.msk.f32.vlgmr.msra.gmra.mrb[0].mxu0 %vm34_vm0, %v16_v14  ;;  %189 = vmatmul.mubr.msk.f32.vlgmr.msra.gmra.mrb[0].mxu1 %vm34_vm0, %v18_v15 }
  0xe7   :  { %v187_v17 = vpop.f32.mrb[0].mxu0  ;;  %v190_v18 = vpop.f32.mrb[0].mxu1 }
  0xe8   :  { %v119_v19 = vadd.f32 %v187_v17, %v152_v16  ;;  %v129_v20 = vadd.f32 %v190_v18, %v152_v16  ;;  %v113_v21 = vpop.f32.mrb[1].mxu0  ;;  %v123_v22 = vpop.f32.mrb[1].mxu1 }
  0xe9   :  { %v114_v23 = vadd.f32 %v152_v16, %v113_v21  ;;  %v124_v24 = vadd.f32 %v152_v16, %v123_v22 }
  0xea   :  { %133 = vst [vmem:[#allocation2 + $0x8] sm:$0xff] %v119_v19  ;;  %135 = vst [vmem:[#allocation2 + $0x18] sm:$0xff] %v129_v20 }
  0xeb   :  { %132 = vst [vmem:[#allocation2] sm:$0xff] %v114_v23  ;;  %134 = vst [vmem:[#allocation2 + $0x10] sm:$0xff] %v124_v24 }
  0xec   :  { %229 = shalt.err (!%p226_p4)
}
  0xed   :  { %s230_s13 = scalar_lea.hbm %s323_s3, 512 }
  0xee   :  { %p231_p5 = scmp.ne.s32.totalorder %s323_s3, %s230_s13  ;;  %p234_p6 = scmp.lt.u32.totalorder %s230_s13, %s323_s3 }
  0xf0   :  { %p236_p7 = pnand %p234_p6, %p231_p5 }
  0xf2   :  { %239 = shalt.err (!%p236_p7)
}
  0xf3   :  { %s243_s18 = smov 128   ;;  %s244_s19 = smov 8  }
  0xf4   :  { %147 = dma.vmem_to_hbm [thread:$0]  %s142_s11, 512, %s323_s3, [#allocation3], %s243_s18, %s243_s18, %s244_s19  }
  0xf5   :  { %240 = dma.done.wait [#allocation3], 512  }
  0xf6   :  { %241 = vsyncadd [#allocation3], 4294966784 }
  0xf7   :  { %151 = vsyncpa [#allocation3], 1 }

</bundles_post_ra>
